<compile_context>
chip_gen: v5e
topology: v5e:2x2
jax: 0.10.0
libtpu: 0.0.40
codegen_flags: <defaults>
</compile_context>

<pallas_src>
import math
import jax
import jax.numpy as jnp
from jax import lax
from jax.experimental import pallas as pl
from jax.experimental.pallas import tpu as pltpu

# ---------------- small configuration consistent with the module -------------
DIM          = 32      # d_model
NUM_HEADS    = 4
NUM_KV_HEADS = 2       # documented equivalence only (see header comment)
HEAD_DIM     = DIM // NUM_HEADS
HIDDEN       = 64      # d_ff
WINDOW       = 4       # sliding-window size (small so the mask is non-trivial)
BATCH        = 2
SEQ          = 8
EPS          = 1e-6
NEG_INF      = -1e30   # finite mask value: robust even if a row were fully masked


def _decoder_block_kernel(x_ref, wq_ref, wk_ref, wv_ref, wo_ref,
                          w1_ref, w2_ref, g1_ref, g2_ref,
                          cos_ref, sin_ref, mask_ref, out_ref):
    H, D = NUM_HEADS, HEAD_DIM
    x = x_ref[...]                                   # (B*S, DIM) f32
    BS = x.shape[0]

    # ---- sublayer 0: RMSNorm -> sliding-window attention -> residual --------
    inv_rms1 = lax.rsqrt(jnp.mean(x * x, axis=-1, keepdims=True) + EPS)
    hn = x * inv_rms1 * g1_ref[...]                  # g1 is (1, DIM)

    # per-head projections as ONE batched matmul each: (H,BS,DIM)@(H,DIM,D)
    hb = jnp.broadcast_to(hn[None], (H, BS, DIM))    # hoisted, done once
    q = jnp.einsum('btd,bdk->btk', hb, wq_ref[...],
                   preferred_element_type=jnp.float32)   # (H, BS, D)
    k = jnp.einsum('btd,bdk->btk', hb, wk_ref[...],
                   preferred_element_type=jnp.float32)
    v = jnp.einsum('btd,bdk->btk', hb, wv_ref[...],
                   preferred_element_type=jnp.float32)

    cosb = cos_ref[...][None]                        # (1, BS, D)
    sinb = sin_ref[...][None]

    def rope(t):                                     # t: (H, BS, D) — called twice
        t1 = t[..., :D // 2]
        t2 = t[..., D // 2:]
        rot = jnp.concatenate([-t2, t1], axis=-1)    # rotate_half
        return t * cosb + rot * sinb

    scale = 1.0 / math.sqrt(D)
    qh = rope(q) * scale
    kh = rope(k)

    # flattened-token attention; mask is block-diagonal over batch + SWA causal
    s = jnp.einsum('btd,bud->btu', qh, kh,
                   preferred_element_type=jnp.float32)   # (H, BS, BS)
    s = s + mask_ref[...][None]
    s = s - jnp.max(s, axis=-1, keepdims=True)
    p = jnp.exp(s)
    p = p * pl.reciprocal(jnp.sum(p, axis=-1, keepdims=True), approx=True)

    o = jnp.einsum('btu,bud->btd', p, v,
                   preferred_element_type=jnp.float32)   # (H, BS, D)
    # per-head output projection + head sum (replaces concat + single big dot)
    attn = jnp.sum(jnp.einsum('btd,bdm->btm', o, wo_ref[...],
                              preferred_element_type=jnp.float32), axis=0)
    x1 = x + attn                                    # residual (dropout = id)

    # ---- sublayer 1: RMSNorm -> SwiGLU feed-forward -> residual --------------
    inv_rms2 = lax.rsqrt(jnp.mean(x1 * x1, axis=-1, keepdims=True) + EPS)
    h2 = x1 * inv_rms2 * g2_ref[...]
    ff = jnp.dot(h2, w1_ref[...], preferred_element_type=jnp.float32)  # (BS, 2*HIDDEN)
    a = ff[:, :HIDDEN]
    b = ff[:, HIDDEN:]
    y = jnp.dot(a * (b * jax.nn.sigmoid(b)), w2_ref[...],
                preferred_element_type=jnp.float32)

    out_ref[...] = x1 + y                            # one contiguous slab store


def decoder_block(x, wq, wk, wv, wo, w1, w2, g1, g2, cos, sin):
    B, S, dm = x.shape
    H, D = NUM_HEADS, HEAD_DIM
    BS = B * S

    # ---- host-side prep (plain XLA ops, tiny, done outside the kernel) ------
    x2 = x.reshape(BS, dm)
    wq3 = wq.reshape(dm, H, D).transpose(1, 0, 2)    # (H, DIM, D)
    wk3 = wk.reshape(dm, H, D).transpose(1, 0, 2)
    wv3 = wv.reshape(dm, H, D).transpose(1, 0, 2)
    wo3 = wo.reshape(H, D, dm)                       # (H, D, DIM)
    cos_f = jnp.tile(cos, (B, 1)).astype(jnp.float32)    # (B*S, D)
    sin_f = jnp.tile(sin, (B, 1)).astype(jnp.float32)

    # block-diagonal-over-batch causal sliding-window mask, finite -1e30
    pos = jnp.arange(BS)
    b_id, s_id = pos // S, pos % S
    diff = s_id[:, None] - s_id[None, :]
    valid = (b_id[:, None] == b_id[None, :]) & (diff >= 0) & (diff < WINDOW)
    mask = jnp.where(valid, 0.0, NEG_INF).astype(jnp.float32)   # (BS, BS)

    def full(arr):
        nd = arr.ndim
        return pl.BlockSpec(arr.shape, lambda i, _nd=nd: (0,) * _nd)

    out2 = pl.pallas_call(
        _decoder_block_kernel,
        out_shape=jax.ShapeDtypeStruct((BS, dm), jnp.float32),
        grid=(1,),                                   # batch fused into the block
        in_specs=[full(x2), full(wq3), full(wk3), full(wv3), full(wo3),
                  full(w1), full(w2), full(g1), full(g2),
                  full(cos_f), full(sin_f), full(mask)],
        out_specs=pl.BlockSpec((BS, dm), lambda i: (0, 0)),
        compiler_params=pltpu.CompilerParams(dimension_semantics=("arbitrary",)),
    )(x2, wq3, wk3, wv3, wo3, w1, w2, g1, g2, cos_f, sin_f, mask)
    return out2.reshape(B, S, dm)


# ---------------- pure-JAX reference (mirrors the PyTorch module) -------------
def reference(x, wq, wk, wv, wo, w1, w2, g1, g2, cos, sin):
    B, S, dm = x.shape
    H, D = NUM_HEADS, HEAD_DIM

    def rmsnorm(t, g):
        return t / jnp.sqrt(jnp.mean(t * t, axis=-1, keepdims=True) + EPS) * g.reshape(-1)

    def rotate_half(t):
        t1, t2 = jnp.split(t, 2, axis=-1)
        return jnp.concatenate([-t2, t1], axis=-1)

    h = rmsnorm(x, g1)
    q = (h @ wq).reshape(B, S, H, D).transpose(0, 2, 1, 3)
    k = (h @ wk).reshape(B, S, H, D).transpose(0, 2, 1, 3)
    v = (h @ wv).reshape(B, S, H, D).transpose(0, 2, 1, 3)
    c = cos[None, None]
    s_ = sin[None, None]
    q = q * c + rotate_half(q) * s_
    k = k * c + rotate_half(k) * s_
    i = jnp.arange(S)[:, None]
    j = jnp.arange(S)[None, :]
    diff = i - j
    mask = jnp.where((diff < 0) | (diff >= WINDOW), -jnp.inf, 0.0)
    scores = jnp.einsum('bhqd,bhkd->bhqk', q, k) / math.sqrt(D) + mask
    p = jax.nn.softmax(scores, axis=-1)
    o = jnp.einsum('bhqk,bhkd->bhqd', p, v).transpose(0, 2, 1, 3).reshape(B, S, dm)
    x1 = x + o @ wo
    h2 = rmsnorm(x1, g2)
    ff = h2 @ w1
    a, b = ff[..., :HIDDEN], ff[..., HIDDEN:]
    y = (a * (b * jax.nn.sigmoid(b))) @ w2
    return x1 + y


if __name__ == "__main__":
    key = jax.random.PRNGKey(0)
    ks = jax.random.split(key, 8)
    scale = 0.05
    x  = jax.random.normal(ks[0], (BATCH, SEQ, DIM), jnp.float32)
    wq = scale * jax.random.normal(ks[1], (DIM, DIM), jnp.float32)
    wk = scale * jax.random.normal(ks[2], (DIM, DIM), jnp.float32)
    wv = scale * jax.random.normal(ks[3], (DIM, DIM), jnp.float32)
    wo = scale * jax.random.normal(ks[4], (DIM, DIM), jnp.float32)
    w1 = scale * jax.random.normal(ks[5], (DIM, 2 * HIDDEN), jnp.float32)
    w2 = scale * jax.random.normal(ks[6], (HIDDEN, DIM), jnp.float32)
    g1 = jnp.ones((1, DIM), jnp.float32)    # RMSNorm weights init to ones
    g2 = jnp.ones((1, DIM), jnp.float32)

    # rotary embeddings, exactly as build_rotary_pos_emb(head_dim, seq)
    inv_freq = 1.0 / (10000.0 ** (jnp.arange(0, HEAD_DIM, 2, dtype=jnp.float32) / HEAD_DIM))
    t = jnp.arange(SEQ, dtype=jnp.float32)
    freqs = jnp.einsum('i,j->ij', t, inv_freq)
    emb = jnp.concatenate([freqs, freqs], axis=-1)      # (SEQ, HEAD_DIM)
    cos = jnp.cos(emb)
    sin = jnp.sin(emb)

    out = decoder_block(x, wq, wk, wv, wo, w1, w2, g1, g2, cos, sin)
    out = jax.block_until_ready(out)

    ref = reference(x, wq, wk, wv, wo, w1, w2, g1, g2, cos, sin)
    assert out.shape == (BATCH, SEQ, DIM)
    assert jnp.allclose(out, ref, atol=1e-3, rtol=1e-3), float(jnp.max(jnp.abs(out - ref)))
    print("KERNEL_OK")
</pallas_src>

<mosaic_0001>
module attributes {stable_mosaic.version = 11 : i64} {
  func.func @_decoder_block_kernel(%arg0: i32, %arg1: memref<16x32xf32, #tpu.memory_space<vmem>>, %arg2: memref<4x32x8xf32, #tpu.memory_space<vmem>>, %arg3: memref<4x32x8xf32, #tpu.memory_space<vmem>>, %arg4: memref<4x32x8xf32, #tpu.memory_space<vmem>>, %arg5: memref<4x8x32xf32, #tpu.memory_space<vmem>>, %arg6: memref<32x128xf32, #tpu.memory_space<vmem>>, %arg7: memref<64x32xf32, #tpu.memory_space<vmem>>, %arg8: memref<1x32xf32, #tpu.memory_space<vmem>>, %arg9: memref<1x32xf32, #tpu.memory_space<vmem>>, %arg10: memref<16x8xf32, #tpu.memory_space<vmem>>, %arg11: memref<16x8xf32, #tpu.memory_space<vmem>>, %arg12: memref<16x16xf32, #tpu.memory_space<vmem>>, %arg13: memref<16x32xf32, #tpu.memory_space<vmem>>) attributes {dimension_semantics = [#tpu.dimension_semantics<arbitrary>], iteration_bounds = array<i64: 1>, scalar_prefetch = 0 : i64, scratch_operands = 0 : i64, tpu.core_type = #tpu.core_type<tc>, window_params = [{pipeline_mode = #tpu.pipeline_mode<synchronous>, transform_indices = @transform_0, window_bounds = array<i64: 16, 32>}, {pipeline_mode = #tpu.pipeline_mode<synchronous>, transform_indices = @transform_1, window_bounds = array<i64: 4, 32, 8>}, {pipeline_mode = #tpu.pipeline_mode<synchronous>, transform_indices = @transform_2, window_bounds = array<i64: 4, 32, 8>}, {pipeline_mode = #tpu.pipeline_mode<synchronous>, transform_indices = @transform_3, window_bounds = array<i64: 4, 32, 8>}, {pipeline_mode = #tpu.pipeline_mode<synchronous>, transform_indices = @transform_4, window_bounds = array<i64: 4, 8, 32>}, {pipeline_mode = #tpu.pipeline_mode<synchronous>, transform_indices = @transform_5, window_bounds = array<i64: 32, 128>}, {pipeline_mode = #tpu.pipeline_mode<synchronous>, transform_indices = @transform_6, window_bounds = array<i64: 64, 32>}, {pipeline_mode = #tpu.pipeline_mode<synchronous>, transform_indices = @transform_7, window_bounds = array<i64: 1, 32>}, {pipeline_mode = #tpu.pipeline_mode<synchronous>, transform_indices = @transform_8, window_bounds = array<i64: 1, 32>}, {pipeline_mode = #tpu.pipeline_mode<synchronous>, transform_indices = @transform_9, window_bounds = array<i64: 16, 8>}, {pipeline_mode = #tpu.pipeline_mode<synchronous>, transform_indices = @transform_10, window_bounds = array<i64: 16, 8>}, {pipeline_mode = #tpu.pipeline_mode<synchronous>, transform_indices = @transform_11, window_bounds = array<i64: 16, 16>}, {pipeline_mode = #tpu.pipeline_mode<synchronous>, transform_indices = @transform_12, window_bounds = array<i64: 16, 32>}]} {
    %c0 = arith.constant 0 : index
    %c0_0 = arith.constant 0 : index
    %0 = vector.load %arg1[%c0, %c0_0] : memref<16x32xf32, #tpu.memory_space<vmem>>, vector<16x32xf32>
    %1 = arith.mulf %0, %0 : vector<16x32xf32>
    %cst = arith.constant dense<0.000000e+00> : vector<16xf32>
    %2 = vector.multi_reduction <add>, %1, %cst [1] : vector<16x32xf32> to vector<16xf32>
    %3 = vector.shape_cast %2 : vector<16xf32> to vector<16x1xf32>
    %cst_1 = arith.constant 3.200000e+01 : f32
    %4 = vector.broadcast %cst_1 : f32 to vector<16x1xf32>
    %5 = arith.divf %3, %4 : vector<16x1xf32>
    %cst_2 = arith.constant 9.99999997E-7 : f32
    %6 = vector.broadcast %cst_2 : f32 to vector<16x1xf32>
    %7 = arith.addf %5, %6 : vector<16x1xf32>
    %8 = math.rsqrt %7 : vector<16x1xf32>
    %9 = vector.broadcast %8 : vector<16x1xf32> to vector<16x32xf32>
    %10 = arith.mulf %0, %9 : vector<16x32xf32>
    %c0_3 = arith.constant 0 : index
    %c0_4 = arith.constant 0 : index
    %11 = vector.load %arg8[%c0_3, %c0_4] : memref<1x32xf32, #tpu.memory_space<vmem>>, vector<1x32xf32>
    %12 = vector.broadcast %11 : vector<1x32xf32> to vector<16x32xf32>
    %13 = arith.mulf %10, %12 : vector<16x32xf32>
    %14 = vector.shape_cast %13 : vector<16x32xf32> to vector<1x16x32xf32>
    %15 = vector.shape_cast %14 : vector<1x16x32xf32> to vector<1x16x32xf32>
    %16 = vector.broadcast %15 : vector<1x16x32xf32> to vector<4x16x32xf32>
    %c0_5 = arith.constant 0 : index
    %c0_6 = arith.constant 0 : index
    %c0_7 = arith.constant 0 : index
    %17 = vector.load %arg2[%c0_5, %c0_6, %c0_7] : memref<4x32x8xf32, #tpu.memory_space<vmem>>, vector<4x32x8xf32>
    "tpu.trace_start"() <{level = 10 : i32, message = "btd,bdk->btk"}> : () -> ()
    %cst_8 = arith.constant dense<0.000000e+00> : vector<4x16x8xf32>
    %18 = tpu.matmul %16, %17, %cst_8 {dimension_numbers = #tpu.dot_dimension_numbers<[2], [1], [1], [2], [0, 0, 0, 1, 1, 2], [0], [0]>} : vector<4x16x32xf32>, vector<4x32x8xf32>, vector<4x16x8xf32> -> vector<4x16x8xf32>
    "tpu.trace_stop"() : () -> ()
    %c0_9 = arith.constant 0 : index
    %c0_10 = arith.constant 0 : index
    %c0_11 = arith.constant 0 : index
    %19 = vector.load %arg3[%c0_9, %c0_10, %c0_11] : memref<4x32x8xf32, #tpu.memory_space<vmem>>, vector<4x32x8xf32>
    "tpu.trace_start"() <{level = 10 : i32, message = "btd,bdk->btk"}> : () -> ()
    %cst_12 = arith.constant dense<0.000000e+00> : vector<4x16x8xf32>
    %20 = tpu.matmul %16, %19, %cst_12 {dimension_numbers = #tpu.dot_dimension_numbers<[2], [1], [1], [2], [0, 0, 0, 1, 1, 2], [0], [0]>} : vector<4x16x32xf32>, vector<4x32x8xf32>, vector<4x16x8xf32> -> vector<4x16x8xf32>
    "tpu.trace_stop"() : () -> ()
    %c0_13 = arith.constant 0 : index
    %c0_14 = arith.constant 0 : index
    %c0_15 = arith.constant 0 : index
    %21 = vector.load %arg4[%c0_13, %c0_14, %c0_15] : memref<4x32x8xf32, #tpu.memory_space<vmem>>, vector<4x32x8xf32>
    "tpu.trace_start"() <{level = 10 : i32, message = "btd,bdk->btk"}> : () -> ()
    %cst_16 = arith.constant dense<0.000000e+00> : vector<4x16x8xf32>
    %22 = tpu.matmul %16, %21, %cst_16 {dimension_numbers = #tpu.dot_dimension_numbers<[2], [1], [1], [2], [0, 0, 0, 1, 1, 2], [0], [0]>} : vector<4x16x32xf32>, vector<4x32x8xf32>, vector<4x16x8xf32> -> vector<4x16x8xf32>
    "tpu.trace_stop"() : () -> ()
    %c0_17 = arith.constant 0 : index
    %c0_18 = arith.constant 0 : index
    %23 = vector.load %arg10[%c0_17, %c0_18] : memref<16x8xf32, #tpu.memory_space<vmem>>, vector<16x8xf32>
    %24 = vector.shape_cast %23 : vector<16x8xf32> to vector<1x16x8xf32>
    %c0_19 = arith.constant 0 : index
    %c0_20 = arith.constant 0 : index
    %25 = vector.load %arg11[%c0_19, %c0_20] : memref<16x8xf32, #tpu.memory_space<vmem>>, vector<16x8xf32>
    %26 = vector.shape_cast %25 : vector<16x8xf32> to vector<1x16x8xf32>
    %27 = vector.extract_strided_slice %18 {offsets = [0, 0, 0], sizes = [4, 16, 4], strides = [1, 1, 1]} : vector<4x16x8xf32> to vector<4x16x4xf32>
    %28 = vector.extract_strided_slice %18 {offsets = [0, 0, 4], sizes = [4, 16, 4], strides = [1, 1, 1]} : vector<4x16x8xf32> to vector<4x16x4xf32>
    %cst_21 = arith.constant 0.000000e+00 : f32
    %29 = vector.broadcast %cst_21 : f32 to vector<4x16x4xf32>
    %30 = arith.subf %29, %28 : vector<4x16x4xf32>
    %31 = tpu.concatenate %30, %27 in 2 : vector<4x16x4xf32>, vector<4x16x4xf32> -> vector<4x16x8xf32>
    %32 = vector.broadcast %24 : vector<1x16x8xf32> to vector<4x16x8xf32>
    %33 = arith.mulf %18, %32 : vector<4x16x8xf32>
    %34 = vector.broadcast %26 : vector<1x16x8xf32> to vector<4x16x8xf32>
    %35 = arith.mulf %31, %34 : vector<4x16x8xf32>
    %36 = arith.addf %33, %35 : vector<4x16x8xf32>
    %cst_22 = arith.constant 0.353553385 : f32
    %37 = vector.broadcast %cst_22 : f32 to vector<4x16x8xf32>
    %38 = arith.mulf %36, %37 : vector<4x16x8xf32>
    %39 = vector.extract_strided_slice %20 {offsets = [0, 0, 0], sizes = [4, 16, 4], strides = [1, 1, 1]} : vector<4x16x8xf32> to vector<4x16x4xf32>
    %40 = vector.extract_strided_slice %20 {offsets = [0, 0, 4], sizes = [4, 16, 4], strides = [1, 1, 1]} : vector<4x16x8xf32> to vector<4x16x4xf32>
    %cst_23 = arith.constant 0.000000e+00 : f32
    %41 = vector.broadcast %cst_23 : f32 to vector<4x16x4xf32>
    %42 = arith.subf %41, %40 : vector<4x16x4xf32>
    %43 = tpu.concatenate %42, %39 in 2 : vector<4x16x4xf32>, vector<4x16x4xf32> -> vector<4x16x8xf32>
    %44 = vector.broadcast %24 : vector<1x16x8xf32> to vector<4x16x8xf32>
    %45 = arith.mulf %20, %44 : vector<4x16x8xf32>
    %46 = vector.broadcast %26 : vector<1x16x8xf32> to vector<4x16x8xf32>
    %47 = arith.mulf %43, %46 : vector<4x16x8xf32>
    %48 = arith.addf %45, %47 : vector<4x16x8xf32>
    "tpu.trace_start"() <{level = 10 : i32, message = "btd,bud->btu"}> : () -> ()
    %cst_24 = arith.constant dense<0.000000e+00> : vector<4x16x16xf32>
    %49 = tpu.matmul %38, %48, %cst_24 {dimension_numbers = #tpu.dot_dimension_numbers<[2], [2], [1], [1], [0, 0, 0, 1, 1, 1], [0], [0]>} : vector<4x16x8xf32>, vector<4x16x8xf32>, vector<4x16x16xf32> -> vector<4x16x16xf32>
    "tpu.trace_stop"() : () -> ()
    %c0_25 = arith.constant 0 : index
    %c0_26 = arith.constant 0 : index
    %50 = vector.load %arg12[%c0_25, %c0_26] : memref<16x16xf32, #tpu.memory_space<vmem>>, vector<16x16xf32>
    %51 = vector.shape_cast %50 : vector<16x16xf32> to vector<1x16x16xf32>
    %52 = vector.broadcast %51 : vector<1x16x16xf32> to vector<4x16x16xf32>
    %53 = arith.addf %49, %52 : vector<4x16x16xf32>
    %cst_27 = arith.constant dense<0xFF800000> : vector<4x16xf32>
    %54 = vector.multi_reduction <maximumf>, %53, %cst_27 [2] : vector<4x16x16xf32> to vector<4x16xf32>
    %55 = vector.shape_cast %54 : vector<4x16xf32> to vector<4x16x1xf32>
    %56 = vector.broadcast %55 : vector<4x16x1xf32> to vector<4x16x16xf32>
    %57 = arith.subf %53, %56 : vector<4x16x16xf32>
    %58 = math.exp %57 : vector<4x16x16xf32>
    %cst_28 = arith.constant dense<0.000000e+00> : vector<4x16xf32>
    %59 = vector.multi_reduction <add>, %58, %cst_28 [2] : vector<4x16x16xf32> to vector<4x16xf32>
    %60 = vector.shape_cast %59 : vector<4x16xf32> to vector<4x16x1xf32>
    %61 = tpu.reciprocal %60 {approx = true} : vector<4x16x1xf32> -> vector<4x16x1xf32>
    %62 = vector.broadcast %61 : vector<4x16x1xf32> to vector<4x16x16xf32>
    %63 = arith.mulf %58, %62 : vector<4x16x16xf32>
    "tpu.trace_start"() <{level = 10 : i32, message = "btu,bud->btd"}> : () -> ()
    %cst_29 = arith.constant dense<0.000000e+00> : vector<4x16x8xf32>
    %64 = tpu.matmul %63, %22, %cst_29 {dimension_numbers = #tpu.dot_dimension_numbers<[2], [1], [1], [2], [0, 0, 0, 1, 1, 2], [0], [0]>} : vector<4x16x16xf32>, vector<4x16x8xf32>, vector<4x16x8xf32> -> vector<4x16x8xf32>
    "tpu.trace_stop"() : () -> ()
    %c0_30 = arith.constant 0 : index
    %c0_31 = arith.constant 0 : index
    %c0_32 = arith.constant 0 : index
    %65 = vector.load %arg5[%c0_30, %c0_31, %c0_32] : memref<4x8x32xf32, #tpu.memory_space<vmem>>, vector<4x8x32xf32>
    "tpu.trace_start"() <{level = 10 : i32, message = "btd,bdm->btm"}> : () -> ()
    %cst_33 = arith.constant dense<0.000000e+00> : vector<4x16x32xf32>
    %66 = tpu.matmul %64, %65, %cst_33 {dimension_numbers = #tpu.dot_dimension_numbers<[2], [1], [1], [2], [0, 0, 0, 1, 1, 2], [0], [0]>} : vector<4x16x8xf32>, vector<4x8x32xf32>, vector<4x16x32xf32> -> vector<4x16x32xf32>
    "tpu.trace_stop"() : () -> ()
    %cst_34 = arith.constant dense<0.000000e+00> : vector<16x32xf32>
    %67 = vector.multi_reduction <add>, %66, %cst_34 [0] : vector<4x16x32xf32> to vector<16x32xf32>
    %68 = arith.addf %0, %67 : vector<16x32xf32>
    %69 = arith.mulf %68, %68 : vector<16x32xf32>
    %cst_35 = arith.constant dense<0.000000e+00> : vector<16xf32>
    %70 = vector.multi_reduction <add>, %69, %cst_35 [1] : vector<16x32xf32> to vector<16xf32>
    %71 = vector.shape_cast %70 : vector<16xf32> to vector<16x1xf32>
    %cst_36 = arith.constant 3.200000e+01 : f32
    %72 = vector.broadcast %cst_36 : f32 to vector<16x1xf32>
    %73 = arith.divf %71, %72 : vector<16x1xf32>
    %cst_37 = arith.constant 9.99999997E-7 : f32
    %74 = vector.broadcast %cst_37 : f32 to vector<16x1xf32>
    %75 = arith.addf %73, %74 : vector<16x1xf32>
    %76 = math.rsqrt %75 : vector<16x1xf32>
    %77 = vector.broadcast %76 : vector<16x1xf32> to vector<16x32xf32>
    %78 = arith.mulf %68, %77 : vector<16x32xf32>
    %c0_38 = arith.constant 0 : index
    %c0_39 = arith.constant 0 : index
    %79 = vector.load %arg9[%c0_38, %c0_39] : memref<1x32xf32, #tpu.memory_space<vmem>>, vector<1x32xf32>
    %80 = vector.broadcast %79 : vector<1x32xf32> to vector<16x32xf32>
    %81 = arith.mulf %78, %80 : vector<16x32xf32>
    %c0_40 = arith.constant 0 : index
    %c0_41 = arith.constant 0 : index
    %82 = vector.load %arg6[%c0_40, %c0_41] : memref<32x128xf32, #tpu.memory_space<vmem>>, vector<32x128xf32>
    %cst_42 = arith.constant dense<0.000000e+00> : vector<16x128xf32>
    %83 = tpu.matmul %81, %82, %cst_42 {dimension_numbers = #tpu.dot_dimension_numbers<[1], [0], [0], [1], [0, 0, 1, 1], [], []>} : vector<16x32xf32>, vector<32x128xf32>, vector<16x128xf32> -> vector<16x128xf32>
    %84 = vector.extract_strided_slice %83 {offsets = [0, 0], sizes = [16, 64], strides = [1, 1]} : vector<16x128xf32> to vector<16x64xf32>
    %85 = vector.extract_strided_slice %83 {offsets = [0, 64], sizes = [16, 64], strides = [1, 1]} : vector<16x128xf32> to vector<16x64xf32>
    %86 = arith.negf %85 : vector<16x64xf32>
    %87 = math.exp %86 : vector<16x64xf32>
    %cst_43 = arith.constant 1.000000e+00 : f32
    %88 = vector.broadcast %cst_43 : f32 to vector<16x64xf32>
    %89 = arith.addf %88, %87 : vector<16x64xf32>
    %90 = arith.divf %88, %89 : vector<16x64xf32>
    %91 = arith.mulf %85, %90 : vector<16x64xf32>
    %92 = arith.mulf %84, %91 : vector<16x64xf32>
    %c0_44 = arith.constant 0 : index
    %c0_45 = arith.constant 0 : index
    %93 = vector.load %arg7[%c0_44, %c0_45] : memref<64x32xf32, #tpu.memory_space<vmem>>, vector<64x32xf32>
    %cst_46 = arith.constant dense<0.000000e+00> : vector<16x32xf32>
    %94 = tpu.matmul %92, %93, %cst_46 {dimension_numbers = #tpu.dot_dimension_numbers<[1], [0], [0], [1], [0, 0, 1, 1], [], []>} : vector<16x64xf32>, vector<64x32xf32>, vector<16x32xf32> -> vector<16x32xf32>
    %95 = arith.addf %68, %94 : vector<16x32xf32>
    %c0_47 = arith.constant 0 : index
    %c0_48 = arith.constant 0 : index
    %96 = vector.load %arg13[%c0_47, %c0_48] : memref<16x32xf32, #tpu.memory_space<vmem>>, vector<16x32xf32>
    tpu.vector_store %arg13[%c0_47, %c0_48], %95 {strides = array<i32>} : memref<16x32xf32, #tpu.memory_space<vmem>>, vector<16x32xf32>,
    return
  }
  func.func @transform_0(%arg0: i32) -> (i32, i32) {
    %c0_i32 = arith.constant 0 : i32
    %c0_i32_0 = arith.constant 0 : i32
    %c0_i32_1 = arith.constant 0 : i32
    return %c0_i32, %c0_i32_0 : i32, i32
  }
  func.func @transform_1(%arg0: i32) -> (i32, i32, i32) {
    %c0_i32 = arith.constant 0 : i32
    %c0_i32_0 = arith.constant 0 : i32
    %c0_i32_1 = arith.constant 0 : i32
    %c0_i32_2 = arith.constant 0 : i32
    return %c0_i32, %c0_i32_0, %c0_i32_1 : i32, i32, i32
  }
  func.func @transform_2(%arg0: i32) -> (i32, i32, i32) {
    %c0_i32 = arith.constant 0 : i32
    %c0_i32_0 = arith.constant 0 : i32
    %c0_i32_1 = arith.constant 0 : i32
    %c0_i32_2 = arith.constant 0 : i32
    return %c0_i32, %c0_i32_0, %c0_i32_1 : i32, i32, i32
  }
  func.func @transform_3(%arg0: i32) -> (i32, i32, i32) {
    %c0_i32 = arith.constant 0 : i32
    %c0_i32_0 = arith.constant 0 : i32
    %c0_i32_1 = arith.constant 0 : i32
    %c0_i32_2 = arith.constant 0 : i32
    return %c0_i32, %c0_i32_0, %c0_i32_1 : i32, i32, i32
  }
  func.func @transform_4(%arg0: i32) -> (i32, i32, i32) {
    %c0_i32 = arith.constant 0 : i32
    %c0_i32_0 = arith.constant 0 : i32
    %c0_i32_1 = arith.constant 0 : i32
    %c0_i32_2 = arith.constant 0 : i32
    return %c0_i32, %c0_i32_0, %c0_i32_1 : i32, i32, i32
  }
  func.func @transform_5(%arg0: i32) -> (i32, i32) {
    %c0_i32 = arith.constant 0 : i32
    %c0_i32_0 = arith.constant 0 : i32
    %c0_i32_1 = arith.constant 0 : i32
    return %c0_i32, %c0_i32_0 : i32, i32
  }
  func.func @transform_6(%arg0: i32) -> (i32, i32) {
    %c0_i32 = arith.constant 0 : i32
    %c0_i32_0 = arith.constant 0 : i32
    %c0_i32_1 = arith.constant 0 : i32
    return %c0_i32, %c0_i32_0 : i32, i32
  }
  func.func @transform_7(%arg0: i32) -> (i32, i32) {
    %c0_i32 = arith.constant 0 : i32
    %c0_i32_0 = arith.constant 0 : i32
    %c0_i32_1 = arith.constant 0 : i32
    return %c0_i32, %c0_i32_0 : i32, i32
  }
  func.func @transform_8(%arg0: i32) -> (i32, i32) {
    %c0_i32 = arith.constant 0 : i32
    %c0_i32_0 = arith.constant 0 : i32
    %c0_i32_1 = arith.constant 0 : i32
    return %c0_i32, %c0_i32_0 : i32, i32
  }
  func.func @transform_9(%arg0: i32) -> (i32, i32) {
    %c0_i32 = arith.constant 0 : i32
    %c0_i32_0 = arith.constant 0 : i32
    %c0_i32_1 = arith.constant 0 : i32
    return %c0_i32, %c0_i32_0 : i32, i32
  }
  func.func @transform_10(%arg0: i32) -> (i32, i32) {
    %c0_i32 = arith.constant 0 : i32
    %c0_i32_0 = arith.constant 0 : i32
    %c0_i32_1 = arith.constant 0 : i32
    return %c0_i32, %c0_i32_0 : i32, i32
  }
  func.func @transform_11(%arg0: i32) -> (i32, i32) {
    %c0_i32 = arith.constant 0 : i32
    %c0_i32_0 = arith.constant 0 : i32
    %c0_i32_1 = arith.constant 0 : i32
    return %c0_i32, %c0_i32_0 : i32, i32
  }
  func.func @transform_12(%arg0: i32) -> (i32, i32) {
    %c0_i32 = arith.constant 0 : i32
    %c0_i32_0 = arith.constant 0 : i32
    %c0_i32_1 = arith.constant 0 : i32
    return %c0_i32, %c0_i32_0 : i32, i32
  }
}

</mosaic_0001>

<bundles_post_ra>
// kernel: tpu_custom_call.1
= control target key start
LH: loop header
LB: loop body
LE: loop exit
PB: predicated region body
PF: predicated region fallthrough
CT: control target
= control target key end

     0   :  { %vm46_vm0 = vcmask 261120   ;;  %s2079_s0 = inlined_call_operand.vmem [shape: f32[16,32], index: 0, kind: input, shape index: {}]   ;;  %s2080_s1 = inlined_call_operand.vmem [shape: f32[4,32,8], index: 1, kind: input, shape index: {}]   ;;  %s2081_s2 = inlined_call_operand.vmem [shape: f32[4,32,8], index: 2, kind: input, shape index: {}]   ;;  %s2082_s3 = inlined_call_operand.vmem [shape: f32[4,32,8], index: 3, kind: input, shape index: {}]   ;;  %s2083_s4 = inlined_call_operand.vmem [shape: f32[4,8,32], index: 4, kind: input, shape index: {}]   ;;  %s2084_s5 = inlined_call_operand.vmem [shape: f32[32,128], index: 5, kind: input, shape index: {}]   ;;  %s2085_s6 = inlined_call_operand.vmem [shape: f32[64,32], index: 6, kind: input, shape index: {}]   ;;  %s2086_s7 = inlined_call_operand.vmem [shape: f32[1,32], index: 7, kind: input, shape index: {}]   ;;  %s2087_s8 = inlined_call_operand.vmem [shape: f32[1,32], index: 8, kind: input, shape index: {}]   ;;  %s2088_s9 = inlined_call_operand.vmem [shape: f32[16,8], index: 9, kind: input, shape index: {}]   ;;  %s2089_s10 = inlined_call_operand.vmem [shape: f32[16,8], index: 10, kind: input, shape index: {}]   ;;  %s2090_s11 = inlined_call_operand.vmem [shape: f32[16,16], index: 11, kind: input, shape index: {}]   ;;  %s2091_s12 = inlined_call_operand.hbm [shape: f32[16,32], index: 12, kind: output, shape index: {}]  }
   0x1   :  { %v1542_v0 = vld [vmem:[%s2079_s0 + $0x8] sm:$0xff] }
   0x2   :  { %v45_v1 = vmul.f32 %v1542_v0, %v1542_v0 }
   0x3   :  { %17 = vsyncpa [#allocation3], 0  ;;  %v1549_v2 = vld [vmem:[%s2079_s0] sm:$0xff]  ;;  %v1467_v6 = vmov 32.0   ;;  %v95_v10 = vld [vmem:[%s2080_s1 + $0x18] sm:$0xff]  ;;  %s1469_s25 = smov 124  }
   0x4   :  { %v50_v3 = vsel %vm46_vm0, %v45_v1, 0.0  ;;  %v44_v4 = vmul.f32 %v1549_v2, %v1549_v2  ;;  %1389 = vrcp.f32 %v1467_v6  ;;  %v99_v11 = vld [vmem:[%s2080_s1 + $0x38] sm:$0xff]  ;;  %1372 = vmatpush.msra.mxu2 %v95_v10  ;;  %v94_v12 = vld [vmem:[%s2080_s1 + $0x10] sm:$0xff]  ;;  %126 = vmatpush.msra.mxu0 %v95_v10  ;;  %v93_v15 = vld [vmem:[%s2080_s1 + $0x8] sm:$0xff]  ;;  %vm498_vm8 = vcmask 31744   ;;  %s1472_s26 = smov 128  }
   0x5   :  { %51 = vadd.xlane.f32.xlu0 %v50_v3  ;;  %1376 = vmatpush.msra.mxu3 %v99_v11  ;;  %v98_v13 = vld [vmem:[%s2080_s1 + $0x30] sm:$0xff]  ;;  %v97_v16 = vld [vmem:[%s2080_s1 + $0x28] sm:$0xff]  ;;  %v92_v17 = vld [vmem:[%s2080_s1] sm:$0xff]  ;;  %vm645_vm9 = vcmask 64512   ;;  %vm786_vm10 = vcmask 130048   ;;  %s1473_s27 = smov 8  }
   0x6   :  { %v47_v5 = vsel %vm46_vm0, %v44_v4, 0.0  ;;  %149 = vmatpush.msra.mxu1 %v99_v11  ;;  %1373 = vmatpush.msra.mxu2 %v94_v12  ;;  %v96_v18 = vld [vmem:[%s2080_s1 + $0x20] sm:$0xff]  ;;  %v103_v20 = vld [vmem:[%s2080_s1 + $0x58] sm:$0xff]  ;;  %v102_v22 = vld [vmem:[%s2080_s1 + $0x50] sm:$0xff] }
   0x7   :  { %1377 = vmatpush.msra.mxu3 %v98_v13  ;;  %127 = vmatpush.msra.mxu0 %v94_v12  ;;  %v107_v21 = vld [vmem:[%s2080_s1 + $0x78] sm:$0xff]  ;;  %v106_v23 = vld [vmem:[%s2080_s1 + $0x70] sm:$0xff]  ;;  %v101_v25 = vld [vmem:[%s2080_s1 + $0x48] sm:$0xff] }
   0x8   :  { %150 = vmatpush.msra.mxu1 %v98_v13  ;;  %1374 = vmatpush.msra.mxu2 %v93_v15  ;;  %v105_v26 = vld [vmem:[%s2080_s1 + $0x68] sm:$0xff]  ;;  %v100_v29 = vld [vmem:[%s2080_s1 + $0x40] sm:$0xff]  ;;  %v209_v32 = vld [vmem:[%s2081_s2 + $0x18] sm:$0xff] }
   0x9   :  { %1378 = vmatpush.msra.mxu3 %v97_v16  ;;  %128 = vmatpush.msra.mxu0 %v93_v15  ;;  %v104_v30 = vld [vmem:[%s2080_s1 + $0x60] sm:$0xff]  ;;  %v213_v33 = vld [vmem:[%s2081_s2 + $0x38] sm:$0xff]  ;;  %v208_v34 = vld [vmem:[%s2081_s2 + $0x10] sm:$0xff] }
   0xa   :  { %v1390_v7 = vpop.eup %1389  ;;  %151 = vmatpush.msra.mxu1 %v97_v16  ;;  %1375 = vmatpush.msra.mxu2 %v92_v17  ;;  %v212_v35 = vld [vmem:[%s2081_s2 + $0x30] sm:$0xff]  ;;  %v207_v36 = vld [vmem:[%s2081_s2 + $0x8] sm:$0xff]  ;;  %v206_v39 = vld [vmem:[%s2081_s2] sm:$0xff] }
   0xb   :  { %v54_v8 = vmul.f32 32.0, %v1390_v7  ;;  %1379 = vmatpush.msra.mxu3 %v96_v18  ;;  %vm58_vm1 = vweird.f32 %v1390_v7  ;;  %129 = vmatpush.msra.mxu0 %v92_v17  ;;  %v211_v37 = vld [vmem:[%s2081_s2 + $0x28] sm:$0xff]  ;;  %v210_v40 = vld [vmem:[%s2081_s2 + $0x20] sm:$0xff]  ;;  %v217_v57 = vld [vmem:[%s2081_s2 + $0x58] sm:$0xff] }
   0xc   :  { %152 = vmatpush.msra.mxu1 %v96_v18  ;;  %172 = vmatpush.msrb.mxu2 %v103_v20  ;;  %v1387_v51 = vld [vmem:[%s2086_s7] ss:$0 sm:$0xff]  ;;  %v221_v58 = vld [vmem:[%s2081_s2 + $0x78] sm:$0xff]  ;;  %v216_v60 = vld [vmem:[%s2081_s2 + $0x50] sm:$0xff]  ;;  %s1471_s7 = smov [#allocation2]  }
   0xd   :  { %48 = vadd.xlane.f32.xlu0 %v47_v5  ;;  %v55_v9 = vsub.f32 1.0, %v54_v8  ;;  %195 = vmatpush.msrb.mxu3 %v107_v21  ;;  %v220_v61 = vld [vmem:[%s2081_s2 + $0x70] sm:$0xff]  ;;  %v215_v63 = vld [vmem:[%s2081_s2 + $0x48] sm:$0xff]  ;;  %v214_v4 = vld [vmem:[%s2081_s2 + $0x40] sm:$0xff]  ;;  %s1296_s24 = sshll.u32 %s1471_s7, 4  ;;  %s1297_s24 = int_to_ptr.vmem [resolvable:$true] %s1296_s24 }
   0xe   :  { %173 = vmatpush.msrb.mxu2 %v102_v22  ;;  %234 = vmatpush.msrb.mxu0 %v209_v32  ;;  %v218_v5 = vld [vmem:[%s2081_s2 + $0x60] sm:$0xff]  ;;  %v325_v8 = vld [vmem:[%s2082_s3 + $0x58] sm:$0xff]  ;;  %v316_v10 = vld [vmem:[%s2082_s3 + $0x10] sm:$0xff] }
   0xf   :  { %v56_v14 = vmul.f32 %v1390_v7, %v55_v9  ;;  %196 = vmatpush.msrb.mxu3 %v106_v23  ;;  %257 = vmatpush.msrb.mxu1 %v213_v33  ;;  %v329_v9 = vld [vmem:[%s2082_s3 + $0x78] sm:$0xff]  ;;  %v320_v11 = vld [vmem:[%s2082_s3 + $0x30] sm:$0xff]  ;;  %v319_v15 = vld [vmem:[%s2082_s3 + $0x28] sm:$0xff] }
  0x10   :  { %174 = vmatpush.msrb.mxu2 %v101_v25  ;;  %235 = vmatpush.msrb.mxu0 %v208_v34  ;;  %v324_v12 = vld [vmem:[%s2082_s3 + $0x50] sm:$0xff]  ;;  %v323_v16 = vld [vmem:[%s2082_s3 + $0x48] sm:$0xff]  ;;  %v314_v18 = vld [vmem:[%s2082_s3] sm:$0xff] }
  0x11   :  { %v57_v19 = vadd.f32 %v1390_v7, %v56_v14  ;;  %197 = vmatpush.msrb.mxu3 %v105_v26  ;;  %258 = vmatpush.msrb.mxu1 %v212_v35  ;;  %v328_v13 = vld [vmem:[%s2082_s3 + $0x70] sm:$0xff]  ;;  %v315_v14 = vld [vmem:[%s2082_s3 + $0x8] sm:$0xff]  ;;  %v322_v20 = vld [vmem:[%s2082_s3 + $0x40] sm:$0xff] }
  0x12   :  { %175 = vmatpush.msrb.mxu2 %v100_v29  ;;  %236 = vmatpush.msrb.mxu0 %v207_v36  ;;  %v327_v17 = vld [vmem:[%s2082_s3 + $0x68] sm:$0xff]  ;;  %v326_v21 = vld [vmem:[%s2082_s3 + $0x60] sm:$0xff] }
  0x13   :  { %v1591_v24 = vsel %vm58_vm1, %v1390_v7, %v57_v19  ;;  %198 = vmatpush.msrb.mxu3 %v104_v30  ;;  %259 = vmatpush.msrb.mxu1 %v211_v37  ;;  %v317_v7 = vld [vmem:[%s2082_s3 + $0x18] sm:$0xff]  ;;  %v318_v19 = vld [vmem:[%s2082_s3 + $0x20] sm:$0xff] }
  0x14   :  { %237 = vmatpush.msrb.mxu0 %v206_v39 }
  0x15   :  { %260 = vmatpush.msrb.mxu1 %v210_v40 }
  0x78   :  { %v52_v27 = vpop.xlane.xlu0 %51 }
  0x79   :  { %v61_v28 = vmul.f32 %v1591_v24, %v52_v27 }
  0x7b   :  { %v63_v31 = vadd.f32 1e-06, %v61_v28 }
  0x7d   :  { %1391 = vrsqrt.f32 %v63_v31  ;;  %vm80_vm3 = vweird.f32 %v63_v31 }
  0x80   :  { %v49_v38 = vpop.xlane.xlu0 %48 }
  0x81   :  { %v60_v41 = vmul.f32 %v1591_v24, %v49_v38 }
  0x83   :  { %v1392_v42 = vpop.eup %1391  ;;  %v62_v43 = vadd.f32 1e-06, %v60_v41 }
  0x84   :  { %v75_v44 = vmul.f32 %v1392_v42, %v63_v31  ;;  %vm81_vm2 = vweird.f32 %v1392_v42 }
  0x85   :  { %1393 = vrsqrt.f32 %v62_v43  ;;  %vm82_vm4 = vmor %vm80_vm3, %vm81_vm2  ;;  %vm70_vm6 = vweird.f32 %v62_v43 }
  0x86   :  { %v76_v45 = vmul.f32 %v1392_v42, %v75_v44 }
  0x88   :  { %v77_v46 = vmul.f32 0.5, %v76_v45 }
  0x8a   :  { %v78_v47 = vsub.f32 1.5, %v77_v46 }
  0x8b   :  { %v1394_v48 = vpop.eup %1393 }
  0x8c   :  { %v79_v49 = vmul.f32 %v1392_v42, %v78_v47  ;;  %v65_v50 = vmul.f32 %v1394_v48, %v62_v43  ;;  %vm71_vm5 = vweird.f32 %v1394_v48 }
  0x8d   :  { %vm72_vm7 = vmor %vm70_vm6, %vm71_vm5 }
  0x8e   :  { %v83_v52 = vsel %vm82_vm4, %v1392_v42, %v79_v49  ;;  %v66_v53 = vmul.f32 %v1394_v48, %v65_v50 }
  0x8f   :  { %v85_v54 = vmul.f32 %v83_v52, %v1542_v0  ;;  %v219_v0 = vld [vmem:[%s2081_s2 + $0x68] sm:$0xff] }
  0x90   :  { %v67_v55 = vmul.f32 0.5, %v66_v53 }
  0x91   :  { %v1635_v56 = vmul.f32 %v1387_v51, %v85_v54 }
  0x92   :  { %v68_v59 = vsub.f32 1.5, %v67_v55 }
  0x93   :  { %1311 = vmatmul.msk.f32.vlgmr.msra.gmra.mxu2 %vm46_vm0, %v1635_v56  ;;  %1313 = vmatmul.msk.f32.vlgmr.msra.gmra.mxu3 %vm46_vm0, %v1635_v56 }
  0x94   :  { %v69_v62 = vmul.f32 %v1394_v48, %v68_v59  ;;  %280 = vmatpush.msra.mxu2 %v217_v57  ;;  %303 = vmatpush.msra.mxu3 %v221_v58  ;;  %v1841_v58 = vld [vmem:[%s2089_s10] sm:$0xff] }
  0x96   :  { %v73_v1 = vsel %vm72_vm7, %v1394_v48, %v69_v62  ;;  %281 = vmatpush.msra.mxu2 %v216_v60  ;;  %304 = vmatpush.msra.mxu3 %v220_v61  ;;  %v1846_v60 = vld [vmem:[%s2088_s9] sm:$0xff] }
  0x97   :  { %v84_v3 = vmul.f32 %v73_v1, %v1549_v2  ;;  %v321_v2 = vld [vmem:[%s2082_s3 + $0x38] sm:$0xff]  ;;  %s1468_s3 = smov 4  }
  0x98   :  { %282 = vmatpush.msra.mxu2 %v215_v63  ;;  %305 = vmatpush.msra.mxu3 %v219_v0 }
  0x99   :  { %v90_v6 = vmul.f32 %v1387_v51, %v84_v3 }
  0x9a   :  { %283 = vmatpush.msra.mxu2 %v214_v4  ;;  %306 = vmatpush.msra.mxu3 %v218_v5  ;;  %v1857_v4 = vld [vmem:[%s2089_s10 + $0x8] sm:$0xff] }
  0x9b   :  { %1310 = vmatmul.msk.f32.vlgmr.msra.gmra.mxu0 %vm46_vm0, %v90_v6  ;;  %1312 = vmatmul.msk.f32.vlgmr.msra.gmra.mxu1 %vm46_vm0, %v90_v6 }
  0x9c   :  { %1314 = vmatmul.msk.f32.vlgmr.msrb.gmra.mxu2 %vm46_vm0, %v90_v6  ;;  %1316 = vmatmul.msk.f32.vlgmr.msrb.gmra.mxu3 %vm46_vm0, %v90_v6 }
  0x9d   :  { %342 = vmatpush.msra.mxu0 %v317_v7  ;;  %365 = vmatpush.msra.mxu1 %v321_v2 }
  0x9e   :  { %388 = vmatpush.msrb.mxu2 %v325_v8  ;;  %411 = vmatpush.msrb.mxu3 %v329_v9 }
  0x9f   :  { %343 = vmatpush.msra.mxu0 %v316_v10  ;;  %366 = vmatpush.msra.mxu1 %v320_v11 }
  0xa0   :  { %389 = vmatpush.msrb.mxu2 %v324_v12  ;;  %412 = vmatpush.msrb.mxu3 %v328_v13 }
  0xa1   :  { %344 = vmatpush.msra.mxu0 %v315_v14  ;;  %367 = vmatpush.msra.mxu1 %v319_v15 }
  0xa2   :  { %390 = vmatpush.msrb.mxu2 %v323_v16  ;;  %413 = vmatpush.msrb.mxu3 %v327_v17 }
  0xa3   :  { %1318 = vmatmul.msk.f32.vlgmr.msrb.gmra.mxu0 %vm46_vm0, %v90_v6  ;;  %1320 = vmatmul.msk.f32.vlgmr.msrb.gmra.mxu1 %vm46_vm0, %v90_v6 }
  0xa4   :  { %1315 = vmatmul.msk.f32.gmra.mxu2 %vm46_vm0, %v1635_v56  ;;  %1317 = vmatmul.msk.f32.gmra.mxu3 %vm46_vm0, %v1635_v56 }
  0xa5   :  { %345 = vmatpush.msra.mxu0 %v314_v18  ;;  %368 = vmatpush.msra.mxu1 %v318_v19 }
  0xa6   :  { %391 = vmatpush.msrb.mxu2 %v322_v20  ;;  %414 = vmatpush.msrb.mxu3 %v326_v21 }
  0xab   :  { %1319 = vmatmul.msk.f32.gmra.mxu0 %vm46_vm0, %v1635_v56  ;;  %1321 = vmatmul.msk.f32.gmra.mxu1 %vm46_vm0, %v1635_v56 }
  0xac   :  { %1322 = vmatmul.msk.f32.vlgmr.msra.gmra.mxu2 %vm46_vm0, %v90_v6  ;;  %1324 = vmatmul.msk.f32.vlgmr.msra.gmra.mxu3 %vm46_vm0, %v90_v6 }
  0xb3   :  { %1326 = vmatmul.msk.f32.vlgmr.msra.gmra.mxu0 %vm46_vm0, %v90_v6  ;;  %1328 = vmatmul.msk.f32.vlgmr.msra.gmra.mxu1 %vm46_vm0, %v90_v6 }
  0xb4   :  { %1323 = vmatmul.msk.f32.gmra.mxu2 %vm46_vm0, %v1635_v56  ;;  %1325 = vmatmul.msk.f32.gmra.mxu3 %vm46_vm0, %v1635_v56 }
  0xbb   :  { %1327 = vmatmul.msk.f32.gmra.mxu0 %vm46_vm0, %v1635_v56  ;;  %1329 = vmatmul.msk.f32.gmra.mxu1 %vm46_vm0, %v1635_v56 }
  0xbc   :  { %1330 = vmatmul.msk.f32.vlgmr.msrb.gmra.mxu2 %vm46_vm0, %v90_v6  ;;  %1332 = vmatmul.msk.f32.vlgmr.msrb.gmra.mxu3 %vm46_vm0, %v90_v6  ;;  %v1862_v6 = vld [vmem:[%s2088_s9 + $0x8] sm:$0xff] }
  0xc4   :  { %1331 = vmatmul.msk.f32.gmra.mxu2 %vm46_vm0, %v1635_v56  ;;  %1333 = vmatmul.msk.f32.gmra.mxu3 %vm46_vm0, %v1635_v56 }
 0x116   :  { %v1746_v22 = vpop.f32.mrf.mxu2  ;;  %v1748_v23 = vpop.f32.mrf.mxu3 }
 0x117   :  { %v429_v50 = vsub.f32 0.0, %v1748_v23  ;;  %v427_v54 = vsub.f32 0.0, %v1746_v22 }
 0x118   :  { %v1750_v25 = vpop.f32.mrf.mxu0  ;;  %v1752_v26 = vpop.f32.mrf.mxu1 }
 0x119   :  { %v426_v52 = vsub.f32 0.0, %v1750_v25  ;;  %v428_v53 = vsub.f32 0.0, %v1752_v26 }
 0x11f   :  { %v1754_v27 = vpop.f32.mrf.mxu2  ;;  %v1756_v28 = vpop.f32.mrf.mxu3 }
 0x120   :  { %486 = vrot.lane.b32.xlu0 %v1756_v28, %s1468_s3  ;;  %482 = vrot.lane.b32.xlu1 %v1754_v27, %s1468_s3  ;;  %v1762_v29 = vpop.f32.mrf.mxu0  ;;  %v1764_v30 = vpop.f32.mrf.mxu1  ;;  %v430_v31 = vsub.f32 0.0, %v1754_v27  ;;  %v432_v32 = vsub.f32 0.0, %v1756_v28  ;;  %v511_v62 = vmul.f32 %v1846_v60, %v1754_v27 }
 0x121   :  { %v539_v43 = vsub.f32 0.0, %v1762_v29  ;;  %v541_v51 = vsub.f32 0.0, %v1764_v30 }
 0x122   :  { %450 = vrot.lane.b32.xlu2 %v430_v31, %s1469_s25 }
 0x127   :  { %v1778_v36 = vpop.f32.mrf.mxu2  ;;  %v1780_v37 = vpop.f32.mrf.mxu3 }
 0x128   :  { %v1769_v33 = vpop.f32.mrf.mxu0  ;;  %v1771_v34 = vpop.f32.mrf.mxu1  ;;  %v433_v38 = vsub.f32 0.0, %v1780_v37  ;;  %v431_v40 = vsub.f32 0.0, %v1778_v36 }
 0x129   :  { %v542_v35 = vsub.f32 0.0, %v1771_v34  ;;  %589 = vrot.lane.b32.xlu1 %v1769_v33, %s1468_s3  ;;  %v540_v41 = vsub.f32 0.0, %v1769_v33  ;;  %v620_v8 = vmul.f32 %v1862_v6, %v1769_v33  ;;  %v622_v12 = vmul.f32 %v1862_v6, %v1771_v34 }
 0x12a   :  { %454 = vrot.lane.b32.xlu2 %v432_v32, %s1469_s25 }
 0x12b   :  { %561 = vrot.lane.b32.xlu0 %v542_v35, %s1469_s25 }
 0x12f   :  { %v1788_v39 = vpop.f32.mrf.mxu2  ;;  %v1802_v44 = vpop.f32.mrf.mxu3 }
 0x130   :  { %v543_v42 = vsub.f32 0.0, %v1788_v39  ;;  %v545_v45 = vsub.f32 0.0, %v1802_v44 }
 0x131   :  { %488 = vrot.lane.b32.xlu1 %v1780_v37, %s1468_s3 }
 0x132   :  { %593 = vrot.lane.b32.xlu2 %v1771_v34, %s1468_s3 }
 0x133   :  { %456 = vrot.lane.b32.xlu0 %v433_v38, %s1469_s25 }
 0x137   :  { %v1810_v46 = vpop.f32.mrf.mxu2  ;;  %v311_v47 = vpop.f32.mrf.mxu3 }
 0x138   :  { %v544_v48 = vsub.f32 0.0, %v1810_v46  ;;  %v546_v49 = vsub.f32 0.0, %v311_v47  ;;  %v626_v33 = vmul.f32 %v1862_v6, %v311_v47 }
 0x139   :  { %452 = vrot.lane.b32.xlu1 %v431_v40, %s1469_s25  ;;  %v347_v40 = vpop.f32.mrf.mxu0 }
 0x13a   :  { %557 = vrot.lane.b32.xlu2 %v540_v41, %s1469_s25 }
 0x13b   :  { %563 = vrot.lane.b32.xlu0 %v543_v42, %s1469_s25 }
 0x13f   :  { %v416_v35 = vpop.f32.mrf.mxu3 }
 0x141   :  { %595 = vrot.lane.b32.xlu1 %v1788_v39, %s1468_s3 }
 0x142   :  { %484 = vrot.lane.b32.xlu2 %v1778_v36, %s1468_s3 }
 0x143   :  { %555 = vrot.lane.b32.xlu0 %v539_v43, %s1469_s25 }
 0x149   :  { %599 = vrot.lane.b32.xlu1 %v1802_v44, %s1468_s3 }
 0x14a   :  { %567 = vrot.lane.b32.xlu2 %v545_v45, %s1469_s25  ;;  %v513_v45 = vmul.f32 %v1846_v60, %v1756_v28 }
 0x14b   :  { %591 = vrot.lane.b32.xlu0 %v1764_v30, %s1468_s3 }
 0x151   :  { %597 = vrot.lane.b32.xlu1 %v1810_v46, %s1468_s3 }
 0x152   :  { %601 = vrot.lane.b32.xlu2 %v311_v47, %s1468_s3  ;;  %v625_v47 = vmul.f32 %v1846_v60, %v1802_v44 }
 0x153   :  { %474 = vrot.lane.b32.xlu0 %v1750_v25, %s1468_s3 }
 0x159   :  { %565 = vrot.lane.b32.xlu1 %v544_v48, %s1469_s25 }
 0x15a   :  { %569 = vrot.lane.b32.xlu2 %v546_v49, %s1469_s25 }
 0x15b   :  { %448 = vrot.lane.b32.xlu0 %v429_v50, %s1469_s25 }
 0x161   :  { %559 = vrot.lane.b32.xlu1 %v541_v51, %s1469_s25 }
 0x162   :  { %587 = vrot.lane.b32.xlu2 %v1762_v29, %s1468_s3 }
 0x169   :  { %442 = vrot.lane.b32.xlu1 %v426_v52, %s1469_s25 }
 0x16a   :  { %446 = vrot.lane.b32.xlu2 %v428_v53, %s1469_s25  ;;  %v619_v53 = vmul.f32 %v1846_v60, %v1762_v29  ;;  %v514_v29 = vmul.f32 %v1862_v6, %v1780_v37  ;;  %v370_v37 = vpop.f32.mrf.mxu1 }
 0x171   :  { %478 = vrot.lane.b32.xlu1 %v1752_v26, %s1468_s3 }
 0x172   :  { %444 = vrot.lane.b32.xlu2 %v427_v54, %s1469_s25 }
 0x179   :  { %476 = vrot.lane.b32.xlu1 %v1746_v22, %s1468_s3 }
 0x17a   :  { %480 = vrot.lane.b32.xlu2 %v1748_v23, %s1468_s3 }
 0x17c   :  { %v451_v55 = vpop.permute.xlu2 %450 }
 0x184   :  { %v455_v56 = vpop.permute.xlu2 %454 }
 0x18c   :  { %v594_v57 = vpop.permute.xlu2 %593 }
 0x192   :  { %v483_v59 = vpop.permute.xlu1 %482  ;;  %v487_v1 = vpop.permute.xlu0 %486 }
 0x193   :  { %v503_v61 = vsel %vm498_vm8, %v451_v55, %v483_v59  ;;  %v505_v38 = vsel %vm498_vm8, %v455_v56, %v487_v1  ;;  %v419_v59 = vpop.f32.mrf.mxu3 }
 0x194   :  { %v519_v63 = vmul.f32 %v503_v61, %v1841_v58  ;;  %v558_v0 = vpop.permute.xlu2 %557  ;;  %v521_v42 = vmul.f32 %v505_v38, %v1841_v58  ;;  %v350_v61 = vpop.f32.mrf.mxu0 }
 0x196   :  { %v1852_v3 = vadd.f32 %v519_v63, %v511_v62  ;;  %v529_v54 = vadd.f32 %v521_v42, %v513_v45 }
 0x198   :  { %v537_v62 = vmul.f32 0.35355338, %v529_v54 }
 0x19b   :  { %v590_v5 = vpop.permute.xlu1 %589 }
 0x19c   :  { %v612_v7 = vsel %vm498_vm8, %v558_v0, %v590_v5  ;;  %v1865_v2 = vpop.permute.xlu2 %484  ;;  %v393_v5 = vpop.f32.mrf.mxu2 }
 0x19d   :  { %v628_v9 = vmul.f32 %v612_v7, %v1857_v4  ;;  %v562_v10 = vpop.permute.xlu0 %561 }
 0x19e   :  { %v614_v11 = vsel %vm498_vm8, %v562_v10, %v594_v57  ;;  %v624_v10 = vmul.f32 %v1862_v6, %v1810_v46 }
 0x19f   :  { %v636_v13 = vadd.f32 %v628_v9, %v620_v8  ;;  %v630_v14 = vmul.f32 %v614_v11, %v1857_v4 }
 0x1a1   :  { %v638_v15 = vadd.f32 %v630_v14, %v622_v12  ;;  %1334 = vmatpush.xpose.msk.msrb.mxu0 %vm645_vm9, %v636_v13 }
 0x1a3   :  { %1338 = vmatpush.xpose.msk.msrb.mxu1 %vm645_vm9, %v638_v15  ;;  %v489_v16 = vpop.permute.xlu1 %488  ;;  %v623_v15 = vmul.f32 %v1846_v60, %v1788_v39  ;;  %v535_v39 = vmul.f32 0.35355338, %v1852_v3 }
 0x1a4   :  { %v568_v17 = vpop.permute.xlu2 %567 }
 0x1a5   :  { %v457_v18 = vpop.permute.xlu0 %456 }
 0x1a6   :  { %v506_v56 = vsel %vm498_vm8, %v457_v18, %v489_v16 }
 0x1a7   :  { %v522_v44 = vmul.f32 %v506_v56, %v1857_v4 }
 0x1a9   :  { %v530_v0 = vadd.f32 %v522_v44, %v514_v29 }
 0x1ab   :  { %v453_v19 = vpop.permute.xlu1 %452  ;;  %v538_v1 = vmul.f32 0.35355338, %v530_v0 }
 0x1ac   :  { %v602_v20 = vpop.permute.xlu2 %601 }
 0x1ad   :  { %v564_v21 = vpop.permute.xlu0 %563 }
 0x1b3   :  { %v596_v27 = vpop.permute.xlu1 %595 }
 0x1b4   :  { %v570_v31 = vpop.permute.xlu2 %569  ;;  %v615_v8 = vsel %vm498_vm8, %v564_v21, %v596_v27  ;;  %v621_v21 = vmul.f32 %v1846_v60, %v1764_v30  ;;  %v396_v27 = vpop.f32.mrf.mxu2 }
 0x1b5   :  { %v618_v32 = vsel %vm498_vm8, %v570_v31, %v602_v20  ;;  %v556_v48 = vpop.permute.xlu0 %555  ;;  %v631_v12 = vmul.f32 %v615_v8, %v1841_v58 }
 0x1b6   :  { %v634_v34 = vmul.f32 %v618_v32, %v1857_v4 }
 0x1b7   :  { %v639_v18 = vadd.f32 %v631_v12, %v623_v15 }
 0x1b8   :  { %v642_v41 = vadd.f32 %v634_v34, %v626_v33 }
 0x1ba   :  { %1346 = vmatpush.xpose.msk.msra.mxu3 %vm645_vm9, %v642_v41 }
 0x1bb   :  { %v600_v43 = vpop.permute.xlu1 %599 }
 0x1bc   :  { %v617_v49 = vsel %vm498_vm8, %v568_v17, %v600_v43  ;;  %v588_v50 = vpop.permute.xlu2 %587  ;;  %v504_v17 = vsel %vm498_vm8, %v453_v19, %v1865_v2  ;;  %v512_v2 = vmul.f32 %v1862_v6, %v1778_v36  ;;  %v373_v19 = vpop.f32.mrf.mxu1 }
 0x1bd   :  { %v633_v51 = vmul.f32 %v617_v49, %v1841_v58  ;;  %v611_v52 = vsel %vm498_vm8, %v556_v48, %v588_v50  ;;  %v592_v16 = vpop.permute.xlu0 %591  ;;  %v520_v32 = vmul.f32 %v504_v17, %v1857_v4  ;;  %v509_v50 = vmul.f32 %v1846_v60, %v1752_v26 }
 0x1be   :  { %v627_v55 = vmul.f32 %v611_v52, %v1841_v58  ;;  %v508_v26 = vmul.f32 %v1862_v6, %v1746_v22  ;;  %v644_v22 = vld [vmem:[%s2090_s11 + $0x8] sm:$0xff] }
 0x1bf   :  { %v641_v28 = vadd.f32 %v633_v51, %v625_v47  ;;  %v528_v30 = vadd.f32 %v520_v32, %v512_v2 }
 0x1c0   :  { %v635_v57 = vadd.f32 %v627_v55, %v619_v53  ;;  %v510_v55 = vmul.f32 %v1862_v6, %v1748_v23  ;;  %v643_v23 = vld [vmem:[%s2090_s11] sm:$0xff] }
 0x1c1   :  { %1347 = vmatpush.xpose.msk.msra.mxu3 %vm645_vm9, %v641_v28  ;;  %v536_v36 = vmul.f32 0.35355338, %v528_v30 }
 0x1c2   :  { %1335 = vmatpush.xpose.msk.msrb.mxu0 %vm645_vm9, %v635_v57 }
 0x1c3   :  { %v598_v63 = vpop.permute.xlu1 %597 }
 0x1c4   :  { %1348 = vmatmul.msk.f32.vlgmr.msra.gmra.mxu3 %vm645_vm9, %v537_v62  ;;  %v447_v13 = vpop.permute.xlu2 %446 }
 0x1c5   :  { %982 = vmatpush.msrb.mxu3 %v419_v59 }
 0x1c6   :  { %895 = vmatpush.msra.mxu0 %v350_v61 }
 0x1c7   :  { %983 = vmatpush.msrb.mxu3 %v416_v35  ;;  %v475_v35 = vpop.permute.xlu0 %474 }
 0x1c8   :  { %896 = vmatpush.msra.mxu0 %v347_v40  ;;  %v507_v40 = vmul.f32 %v1846_v60, %v1750_v25 }
 0x1cb   :  { %v566_v7 = vpop.permute.xlu1 %565 }
 0x1cc   :  { %v616_v9 = vsel %vm498_vm8, %v566_v7, %v598_v63  ;;  %1349 = vmatmul.msk.f32.gmra.mxu3 %vm645_vm9, %v538_v1  ;;  %v445_v34 = vpop.permute.xlu2 %444 }
 0x1cd   :  { %v632_v11 = vmul.f32 %v616_v9, %v1857_v4 }
 0x1cf   :  { %v640_v14 = vadd.f32 %v632_v11, %v624_v10  ;;  %v449_v47 = vpop.permute.xlu0 %448 }
 0x1d1   :  { %1342 = vmatpush.xpose.msk.msra.mxu2 %vm645_vm9, %v640_v14 }
 0x1d3   :  { %v560_v20 = vpop.permute.xlu1 %559 }
 0x1d4   :  { %v613_v46 = vsel %vm498_vm8, %v560_v20, %v592_v16  ;;  %v481_v45 = vpop.permute.xlu2 %480 }
 0x1d5   :  { %v629_v31 = vmul.f32 %v613_v46, %v1841_v58  ;;  %1343 = vmatpush.xpose.msk.msra.mxu2 %vm645_vm9, %v639_v18  ;;  %v502_v25 = vsel %vm498_vm8, %v449_v47, %v481_v45 }
 0x1d6   :  { %v518_v53 = vmul.f32 %v502_v25, %v1857_v4 }
 0x1d7   :  { %v637_v33 = vadd.f32 %v629_v31, %v621_v21 }
 0x1d8   :  { %1344 = vmatmul.msk.f32.vlgmr.msra.gmra.mxu2 %vm645_vm9, %v535_v39 }
 0x1d9   :  { %953 = vmatpush.msrb.mxu2 %v396_v27  ;;  %1339 = vmatpush.xpose.msk.msrb.mxu1 %vm645_vm9, %v637_v33 }
 0x1db   :  { %954 = vmatpush.msrb.mxu2 %v393_v5  ;;  %v443_v38 = vpop.permute.xlu1 %442 }
 0x1dc   :  { %v499_v3 = vsel %vm498_vm8, %v443_v38, %v475_v35 }
 0x1dd   :  { %924 = vmatpush.msra.mxu1 %v373_v19  ;;  %v515_v41 = vmul.f32 %v499_v3, %v1841_v58 }
 0x1df   :  { %925 = vmatpush.msra.mxu1 %v370_v37  ;;  %v523_v42 = vadd.f32 %v515_v41, %v507_v40 }
 0x1e0   :  { %1345 = vmatmul.msk.f32.gmra.mxu2 %vm645_vm9, %v536_v36 }
 0x1e1   :  { %v531_v43 = vmul.f32 0.35355338, %v523_v42 }
 0x1e3   :  { %v479_v48 = vpop.permute.xlu1 %478  ;;  %1336 = vmatmul.msk.f32.vlgmr.msrb.gmra.mxu0 %vm645_vm9, %v531_v43 }
 0x1e4   :  { %v501_v49 = vsel %vm498_vm8, %v447_v13, %v479_v48 }
 0x1e5   :  { %v517_v51 = vmul.f32 %v501_v49, %v1841_v58  ;;  %v526_v58 = vadd.f32 %v518_v53, %v510_v55 }
 0x1e7   :  { %v525_v52 = vadd.f32 %v517_v51, %v509_v50  ;;  %v534_v61 = vmul.f32 0.35355338, %v526_v58 }
 0x1e9   :  { %v533_v54 = vmul.f32 0.35355338, %v525_v52 }
 0x1eb   :  { %v477_v56 = vpop.permute.xlu1 %476  ;;  %1340 = vmatmul.msk.f32.vlgmr.msrb.gmra.mxu1 %vm645_vm9, %v533_v54 }
 0x1ec   :  { %v500_v28 = vsel %vm498_vm8, %v445_v34, %v477_v56 }
 0x1ed   :  { %v516_v60 = vmul.f32 %v500_v28, %v1857_v4 }
 0x1ef   :  { %v524_v57 = vadd.f32 %v516_v60, %v508_v26 }
 0x1f1   :  { %v532_v59 = vmul.f32 0.35355338, %v524_v57 }
 0x1f3   :  { %1337 = vmatmul.msk.f32.gmra.mxu0 %vm645_vm9, %v532_v59  ;;  %1341 = vmatmul.msk.f32.gmra.mxu1 %vm645_vm9, %v534_v61 }
 0x247   :  { %v780_v62 = vpop.f32.mrf.mxu3 }
 0x248   :  { %v781_v44 = vadd.f32 %v780_v62, %v643_v23 }
 0x24a   :  { %v805_v63 = vsel %vm786_vm10, %v781_v44, -inf }
 0x24b   :  { %806 = vmax.xlane.f32.xlu1 %v805_v63 }
 0x24f   :  { %v783_v4 = vpop.f32.mrf.mxu3 }
 0x250   :  { %v784_v6 = vadd.f32 %v783_v4, %v644_v22 }
 0x252   :  { %v808_v29 = vsel %vm786_vm10, %v784_v6, -inf }
 0x253   :  { %809 = vmax.xlane.f32.xlu1 %v808_v29 }
 0x25b   :  { %v745_v0 = vpop.f32.mrf.mxu2 }
 0x25c   :  { %v746_v1 = vadd.f32 %v745_v0, %v643_v23 }
 0x25e   :  { %v799_v5 = vsel %vm786_vm10, %v746_v1, -inf }
 0x25f   :  { %800 = vmax.xlane.f32.xlu0 %v799_v5 }
 0x260   :  { %v675_v7 = vpop.f32.mrf.mxu0 }
 0x261   :  { %v676_v8 = vadd.f32 %v675_v7, %v643_v23 }
 0x263   :  { %v748_v9 = vpop.f32.mrf.mxu2  ;;  %v787_v37 = vsel %vm786_vm10, %v676_v8, -inf }
 0x264   :  { %v749_v10 = vadd.f32 %v748_v9, %v644_v22 }
 0x266   :  { %v802_v11 = vsel %vm786_vm10, %v749_v10, -inf }
 0x267   :  { %803 = vmax.xlane.f32.xlu2 %v802_v11  ;;  %788 = vmax.xlane.f32.xlu0 %v787_v37 }
 0x268   :  { %v710_v12 = vpop.f32.mrf.mxu1 }
 0x269   :  { %v711_v13 = vadd.f32 %v710_v12, %v643_v23 }
 0x26b   :  { %v793_v14 = vsel %vm786_vm10, %v711_v13, -inf }
 0x26f   :  { %794 = vmax.xlane.f32.xlu2 %v793_v14 }
 0x270   :  { %v678_v15 = vpop.f32.mrf.mxu0  ;;  %v713_v16 = vpop.f32.mrf.mxu1 }
 0x271   :  { %v679_v17 = vadd.f32 %v678_v15, %v644_v22  ;;  %v714_v18 = vadd.f32 %v713_v16, %v644_v22 }
 0x273   :  { %v790_v20 = vsel %vm786_vm10, %v679_v17, -inf  ;;  %v796_v46 = vsel %vm786_vm10, %v714_v18, -inf }
 0x274   :  { %791 = vmax.xlane.f32.xlu0 %v790_v20 }
 0x277   :  { %797 = vmax.xlane.f32.xlu2 %v796_v46 }
 0x2be   :  { %v807_v21 = vpop.xlane.xlu1 %806 }
 0x2bf   :  { %v817_v27 = vsub.f32 %v781_v44, %v807_v21 }
 0x2c1   :  { %v831_v31 = vmul.f32 1.442695, %v817_v27  ;;  %v994_v27 = vld [vmem:[%s2083_s4 + $0x18] sm:$0xff] }
 0x2c2   :  { %1103 = vmatpush.msra.mxu3 %v994_v27 }
 0x2c3   :  { %1395 = vpow2.f32 %v831_v31  ;;  %v993_v31 = vld [vmem:[%s2083_s4 + $0x10] sm:$0xff] }
 0x2c4   :  { %1074 = vmatpush.msra.mxu2 %v993_v31 }
 0x2c6   :  { %v810_v34 = vpop.xlane.xlu1 %809 }
 0x2c7   :  { %v818_v41 = vsub.f32 %v784_v6, %v810_v34 }
 0x2c9   :  { %v1396_v39 = vpop.eup %1395  ;;  %v833_v45 = vmul.f32 1.442695, %v818_v41 }
 0x2ca   :  { %v853_v32 = vsel %vm786_vm10, %v1396_v39, 0.0 }
 0x2cb   :  { %854 = vadd.xlane.f32.xlu0 %v853_v32  ;;  %v992_v32 = vld [vmem:[%s2083_s4 + $0x8] sm:$0xff] }
 0x2cc   :  { %1045 = vmatpush.msrb.mxu1 %v992_v32 }
 0x2d2   :  { %v801_v33 = vpop.xlane.xlu0 %800 }
 0x2d3   :  { %v815_v2 = vsub.f32 %v746_v1, %v801_v33 }
 0x2d5   :  { %v827_v19 = vmul.f32 1.442695, %v815_v2 }
 0x2d7   :  { %1397 = vpow2.f32 %v827_v19 }
 0x2da   :  { %v804_v30 = vpop.xlane.xlu2 %803  ;;  %v789_v35 = vpop.xlane.xlu0 %788 }
 0x2db   :  { %v816_v38 = vsub.f32 %v749_v10, %v804_v30  ;;  %v811_v3 = vsub.f32 %v676_v8, %v789_v35 }
 0x2dd   :  { %v1398_v40 = vpop.eup %1397  ;;  %v829_v36 = vmul.f32 1.442695, %v816_v38  ;;  %v819_v42 = vmul.f32 1.442695, %v811_v3 }
 0x2de   :  { %v847_v43 = vsel %vm786_vm10, %v1398_v40, 0.0 }
 0x2df   :  { %1399 = vpow2.f32 %v829_v36  ;;  %848 = vadd.xlane.f32.xlu1 %v847_v43 }
 0x2e0   :  { %1401 = vpow2.f32 %v819_v42 }
 0x2e1   :  { %1403 = vpow2.f32 %v833_v45 }
 0x2e2   :  { %v795_v48 = vpop.xlane.xlu2 %794 }
 0x2e3   :  { %v813_v49 = vsub.f32 %v711_v13, %v795_v48 }
 0x2e5   :  { %v1400_v50 = vpop.eup %1399  ;;  %v823_v47 = vmul.f32 1.442695, %v813_v49 }
 0x2e6   :  { %v1402_v51 = vpop.eup %1401  ;;  %v850_v25 = vsel %vm786_vm10, %v1400_v50, 0.0 }
 0x2e7   :  { %1405 = vpow2.f32 %v823_v47  ;;  %851 = vadd.xlane.f32.xlu2 %v850_v25  ;;  %v835_v52 = vsel %vm786_vm10, %v1402_v51, 0.0  ;;  %v792_v53 = vpop.xlane.xlu0 %791  ;;  %v1404_v28 = vpop.eup %1403 }
 0x2e8   :  { %836 = vadd.xlane.f32.xlu1 %v835_v52  ;;  %v812_v54 = vsub.f32 %v679_v17, %v792_v53  ;;  %v856_v57 = vsel %vm786_vm10, %v1404_v28, 0.0 }
 0x2ea   :  { %v821_v55 = vmul.f32 1.442695, %v812_v54  ;;  %v798_v56 = vpop.xlane.xlu2 %797  ;;  %v1439_v54 = vld [vmem:[%s2079_s0] sm:$0xff] }
 0x2eb   :  { %v814_v26 = vsub.f32 %v714_v18, %v798_v56 }
 0x2ec   :  { %1407 = vpow2.f32 %v821_v55 }
 0x2ed   :  { %v1406_v60 = vpop.eup %1405  ;;  %v825_v58 = vmul.f32 1.442695, %v814_v26 }
 0x2ee   :  { %v841_v59 = vsel %vm786_vm10, %v1406_v60, 0.0 }
 0x2ef   :  { %1409 = vpow2.f32 %v825_v58  ;;  %857 = vadd.xlane.f32.xlu2 %v856_v57  ;;  %842 = vadd.xlane.f32.xlu0 %v841_v59 }
 0x2f2   :  { %v1408_v61 = vpop.eup %1407 }
 0x2f3   :  { %v838_v23 = vsel %vm786_vm10, %v1408_v61, 0.0 }
 0x2f4   :  { %839 = vadd.xlane.f32.xlu1 %v838_v23 }
 0x2f5   :  { %v1410_v62 = vpop.eup %1409 }
 0x2f6   :  { %v844_v44 = vsel %vm786_vm10, %v1410_v62, 0.0 }
 0x2f7   :  { %845 = vadd.xlane.f32.xlu0 %v844_v44  ;;  %v1440_v44 = vld [vmem:[%s2079_s0 + $0x8] sm:$0xff] }
 0x33e   :  { %v855_v63 = vpop.xlane.xlu0 %854 }
 0x33f   :  { %1411 = vrcp.f32 %v855_v63 }
 0x345   :  { %v1412_v22 = vpop.eup %1411 }
 0x346   :  { %v873_v4 = vmul.f32 %v1412_v22, %v1396_v39  ;;  %v991_v39 = vld [vmem:[%s2083_s4] sm:$0xff] }
 0x347   :  { %1016 = vmatpush.msrb.mxu0 %v991_v39 }
 0x348   :  { %1356 = vmatmul.msk.f32.vlgmr.msrb.gmra.mxu3 %vm786_vm10, %v873_v4 }
 0x352   :  { %v849_v6 = vpop.xlane.xlu1 %848 }
 0x353   :  { %1413 = vrcp.f32 %v849_v6  ;;  %v1170_v6 = vld [vmem:[%s2084_s5 + $0x18] sm:$0xff] }
 0x359   :  { %v1414_v29 = vpop.eup %1413 }
 0x35a   :  { %v871_v0 = vmul.f32 %v1414_v29, %v1398_v40  ;;  %v852_v1 = vpop.xlane.xlu2 %851  ;;  %v1169_v29 = vld [vmem:[%s2084_s5 + $0x10] sm:$0xff] }
 0x35b   :  { %1415 = vrcp.f32 %v852_v1  ;;  %v837_v5 = vpop.xlane.xlu1 %836  ;;  %v1167_v1 = vld [vmem:[%s2084_s5] sm:$0xff] }
 0x35c   :  { %1417 = vrcp.f32 %v837_v5  ;;  %1354 = vmatmul.msk.f32.vlgmr.msrb.gmra.mxu2 %vm786_vm10, %v871_v0  ;;  %v1168_v0 = vld [vmem:[%s2084_s5 + $0x8] sm:$0xff] }
 0x361   :  { %v1416_v7 = vpop.eup %1415 }
 0x362   :  { %v1418_v8 = vpop.eup %1417  ;;  %v858_v9 = vpop.xlane.xlu2 %857  ;;  %v872_v11 = vmul.f32 %v1416_v7, %v1400_v50 }
 0x363   :  { %v843_v10 = vpop.xlane.xlu0 %842  ;;  %v867_v37 = vmul.f32 %v1418_v8, %v1402_v51  ;;  %1419 = vrcp.f32 %v858_v9 }
 0x364   :  { %1421 = vrcp.f32 %v843_v10  ;;  %1355 = vmatmul.msk.f32.gmra.mxu2 %vm786_vm10, %v872_v11 }
 0x365   :  { %1350 = vmatmul.msk.f32.vlgmr.msra.gmra.mxu0 %vm786_vm10, %v867_v37 }
 0x366   :  { %1189 = vmatpush.msra.mxu0 %v1170_v6  ;;  %v1254_v6 = vld [vmem:[%s2085_s6 + $0x20] sm:$0xff] }
 0x367   :  { %v840_v12 = vpop.xlane.xlu1 %839 }
 0x368   :  { %1423 = vrcp.f32 %v840_v12  ;;  %1190 = vmatpush.msra.mxu0 %v1169_v29  ;;  %v1253_v29 = vld [vmem:[%s2085_s6 + $0x18] sm:$0xff] }
 0x369   :  { %v1420_v13 = vpop.eup %1419 }
 0x36a   :  { %v1422_v14 = vpop.eup %1421  ;;  %v874_v16 = vmul.f32 %v1420_v13, %v1404_v28  ;;  %1191 = vmatpush.msra.mxu0 %v1168_v0  ;;  %v1252_v0 = vld [vmem:[%s2085_s6 + $0x10] sm:$0xff] }
 0x36b   :  { %v846_v15 = vpop.xlane.xlu0 %845  ;;  %v869_v17 = vmul.f32 %v1422_v14, %v1406_v60 }
 0x36c   :  { %1425 = vrcp.f32 %v846_v15  ;;  %1357 = vmatmul.msk.f32.gmra.mxu3 %vm786_vm10, %v874_v16  ;;  %1192 = vmatpush.msra.mxu0 %v1167_v1  ;;  %v1251_v1 = vld [vmem:[%s2085_s6 + $0x8] sm:$0xff] }
 0x36d   :  { %1352 = vmatmul.msk.f32.vlgmr.msra.gmra.mxu1 %vm786_vm10, %v869_v17 }
 0x36e   :  { %v1424_v18 = vpop.eup %1423 }
 0x36f   :  { %v868_v20 = vmul.f32 %v1424_v18, %v1408_v61 }
 0x371   :  { %1351 = vmatmul.msk.f32.gmra.mxu0 %vm786_vm10, %v868_v20  ;;  %v1388_v20 = vld [vmem:[%s2087_s8] ss:$0 sm:$0xff]  ;;  %s1470_s8 = smov 64  }
 0x372   :  { %v1426_v46 = vpop.eup %1425 }
 0x373   :  { %v870_v21 = vmul.f32 %v1426_v46, %v1410_v62 }
 0x375   :  { %1353 = vmatmul.msk.f32.gmra.mxu1 %vm786_vm10, %v870_v21  ;;  %vm1258_vm10 = vcmask 523264  }
 0x3cb   :  { %v985_v33 = vpop.f32.mrf.mxu3 }
 0x3cc   :  { %1364 = vmatmul.msk.f32.vlgmr.msra.gmra.mxu3 %vm645_vm9, %v985_v33 }
 0x3df   :  { %v956_v2 = vpop.f32.mrf.mxu2 }
 0x3e0   :  { %1362 = vmatmul.msk.f32.vlgmr.msra.gmra.mxu2 %vm645_vm9, %v956_v2 }
 0x3e2   :  { %v898_v19 = vpop.f32.mrf.mxu0 }
 0x3e3   :  { %1358 = vmatmul.msk.f32.vlgmr.msrb.gmra.mxu0 %vm645_vm9, %v898_v19 }
 0x3e7   :  { %v959_v34 = vpop.f32.mrf.mxu2 }
 0x3e8   :  { %1363 = vmatmul.msk.f32.gmra.mxu2 %vm645_vm9, %v959_v34 }
 0x3ea   :  { %v927_v30 = vpop.f32.mrf.mxu1 }
 0x3eb   :  { %1360 = vmatmul.msk.f32.vlgmr.msrb.gmra.mxu1 %vm645_vm9, %v927_v30 }
 0x3ee   :  { %v901_v35 = vpop.f32.mrf.mxu0 }
 0x3ef   :  { %v988_v38 = vpop.f32.mrf.mxu3  ;;  %1359 = vmatmul.msk.f32.gmra.mxu0 %vm645_vm9, %v901_v35 }
 0x3f0   :  { %1365 = vmatmul.msk.f32.gmra.mxu3 %vm645_vm9, %v988_v38 }
 0x3f2   :  { %v930_v3 = vpop.f32.mrf.mxu1 }
 0x3f3   :  { %1361 = vmatmul.msk.f32.gmra.mxu1 %vm645_vm9, %v930_v3 }
 0x44f   :  { %v1105_v45 = vpop.f32.mrf.mxu3 }
 0x450   :  { %v1116_v47 = vsel %vm46_vm0, %v1105_v45, 0.0 }
 0x460   :  { %v1018_v40 = vpop.f32.mrf.mxu0 }
 0x461   :  { %v1111_v42 = vsel %vm46_vm0, %v1018_v40, 0.0 }
 0x463   :  { %v1076_v41 = vpop.f32.mrf.mxu2 }
 0x464   :  { %v1114_v49 = vsel %vm46_vm0, %v1076_v41, 0.0 }
 0x468   :  { %v1047_v36 = vpop.f32.mrf.mxu1 }
 0x469   :  { %v1112_v43 = vsel %vm46_vm0, %v1047_v36, 0.0 }
 0x46a   :  { %v1113_v48 = vadd.f32 %v1112_v43, %v1111_v42 }
 0x46b   :  { %v1079_v52 = vpop.f32.mrf.mxu2 }
 0x46c   :  { %v1115_v50 = vadd.f32 %v1114_v49, %v1113_v48  ;;  %v1021_v25 = vpop.f32.mrf.mxu0  ;;  %v1121_v58 = vsel %vm46_vm0, %v1079_v52, 0.0 }
 0x46d   :  { %v1118_v56 = vsel %vm46_vm0, %v1021_v25, 0.0 }
 0x46e   :  { %v1117_v51 = vadd.f32 %v1116_v47, %v1115_v50 }
 0x470   :  { %v1050_v53 = vpop.f32.mrf.mxu1  ;;  %v2000_v55 = vadd.f32 %v1439_v54, %v1117_v51 }
 0x471   :  { %v1119_v28 = vsel %vm46_vm0, %v1050_v53, 0.0 }
 0x472   :  { %v1120_v26 = vadd.f32 %v1119_v28, %v1118_v56  ;;  %v1127_v60 = vmul.f32 %v2000_v55, %v2000_v55 }
 0x473   :  { %v1108_v57 = vpop.f32.mrf.mxu3 }
 0x474   :  { %v1122_v59 = vadd.f32 %v1121_v58, %v1120_v26  ;;  %v1123_v61 = vsel %vm46_vm0, %v1108_v57, 0.0  ;;  %v1129_v23 = vsel %vm46_vm0, %v1127_v60, 0.0 }
 0x475   :  { %1130 = vadd.xlane.f32.xlu2 %v1129_v23 }
 0x476   :  { %v1124_v62 = vadd.f32 %v1123_v61, %v1122_v59 }
 0x478   :  { %v2012_v63 = vadd.f32 %v1440_v44, %v1124_v62  ;;  %v1257_v44 = vld [vmem:[%s2085_s6 + $0x38] sm:$0xff] }
 0x479   :  { %1273 = vmatpush.msra.mxu1 %v1257_v44 }
 0x47a   :  { %v1128_v22 = vmul.f32 %v2012_v63, %v2012_v63 }
 0x47c   :  { %v1132_v4 = vsel %vm46_vm0, %v1128_v22, 0.0  ;;  %v1256_v22 = vld [vmem:[%s2085_s6 + $0x30] sm:$0xff] }
 0x47d   :  { %1133 = vadd.xlane.f32.xlu1 %v1132_v4  ;;  %v1255_v4 = vld [vmem:[%s2085_s6 + $0x28] sm:$0xff]  ;;  %1274 = vmatpush.msra.mxu1 %v1256_v22 }
 0x47f   :  { %1275 = vmatpush.msra.mxu1 %v1255_v4 }
 0x481   :  { %1276 = vmatpush.msra.mxu1 %v1254_v6 }
 0x483   :  { %1277 = vmatpush.msra.mxu1 %v1253_v29 }
 0x485   :  { %1278 = vmatpush.msra.mxu1 %v1252_v0 }
 0x487   :  { %1279 = vmatpush.msra.mxu1 %v1251_v1 }
 0x4e8   :  { %v1131_v5 = vpop.xlane.xlu2 %1130 }
 0x4e9   :  { %v1135_v7 = vmul.f32 %v1131_v5, %v1591_v24  ;;  %v1250_v5 = vld [vmem:[%s2085_s6] sm:$0xff]  ;;  %s1298_s6 = sshll.u32 %s2091_s12, 4  ;;  %s1299_s6 = int_to_ptr.hbm [resolvable:$true] %s1298_s6 }
 0x4ea   :  { %1280 = vmatpush.msra.mxu1 %v1250_v5 }
 0x4eb   :  { %v1137_v8 = vadd.f32 1e-06, %v1135_v7 }
 0x4ed   :  { %1427 = vrsqrt.f32 %v1137_v8  ;;  %vm1145_vm12 = vweird.f32 %v1137_v8 }
 0x4f0   :  { %v1134_v9 = vpop.xlane.xlu1 %1133 }
 0x4f1   :  { %v1136_v10 = vmul.f32 %v1134_v9, %v1591_v24 }
 0x4f3   :  { %v1428_v11 = vpop.eup %1427  ;;  %v1138_v37 = vadd.f32 1e-06, %v1136_v10 }
 0x4f4   :  { %v1140_v12 = vmul.f32 %v1428_v11, %v1137_v8  ;;  %vm1146_vm11 = vweird.f32 %v1428_v11 }
 0x4f5   :  { %1429 = vrsqrt.f32 %v1138_v37  ;;  %vm1147_vm13 = vmor %vm1145_vm12, %vm1146_vm11  ;;  %vm1155_vm15 = vweird.f32 %v1138_v37 }
 0x4f6   :  { %v1141_v13 = vmul.f32 %v1428_v11, %v1140_v12 }
 0x4f8   :  { %v1142_v14 = vmul.f32 0.5, %v1141_v13 }
 0x4fa   :  { %v1143_v15 = vsub.f32 1.5, %v1142_v14 }
 0x4fb   :  { %v1430_v16 = vpop.eup %1429 }
 0x4fc   :  { %v1144_v17 = vmul.f32 %v1428_v11, %v1143_v15  ;;  %v1150_v18 = vmul.f32 %v1430_v16, %v1138_v37  ;;  %vm1156_vm14 = vweird.f32 %v1430_v16 }
 0x4fd   :  { %vm1157_vm1 = vmor %vm1155_vm15, %vm1156_vm14 }
 0x4fe   :  { %v1148_v46 = vsel %vm1147_vm13, %v1428_v11, %v1144_v17  ;;  %v1151_v21 = vmul.f32 %v1430_v16, %v1150_v18 }
 0x4ff   :  { %v1159_v24 = vmul.f32 %v1148_v46, %v2000_v55 }
 0x500   :  { %v1152_v27 = vmul.f32 0.5, %v1151_v21 }
 0x501   :  { %v1165_v31 = vmul.f32 %v1388_v20, %v1159_v24 }
 0x502   :  { %v1153_v39 = vsub.f32 1.5, %v1152_v27 }
 0x503   :  { %1366 = vmatmul.msk.f32.vlgmr.msra.gmra.mxu0 %vm46_vm0, %v1165_v31 }
 0x504   :  { %v1154_v32 = vmul.f32 %v1430_v16, %v1153_v39 }
 0x506   :  { %v1158_v33 = vsel %vm1157_vm1, %v1430_v16, %v1154_v32 }
 0x507   :  { %v1160_v2 = vmul.f32 %v1158_v33, %v2012_v63 }
 0x509   :  { %v1166_v19 = vmul.f32 %v1388_v20, %v1160_v2 }
 0x50b   :  { %1367 = vmatmul.msk.f32.gmra.mxu0 %vm46_vm0, %v1166_v19 }
 0x580   :  { %v2038_v34 = vpop.f32.mrf.mxu0 }
 0x581   :  { %v1368_v30 = vmul.f32 -1.442695, %v2038_v34 }
 0x583   :  { %1431 = vpow2.f32 %v1368_v30 }
 0x588   :  { %v2041_v35 = vpop.f32.mrf.mxu0 }
 0x589   :  { %v1432_v38 = vpop.eup %1431  ;;  %v1369_v3 = vmul.f32 -1.442695, %v2041_v35 }
 0x58a   :  { %v1206_v40 = vadd.f32 1.0, %v1432_v38 }
 0x58b   :  { %1433 = vpow2.f32 %v1369_v3 }
 0x58c   :  { %1435 = vrcp.f32 %v1206_v40  ;;  %v1219_v48 = vand.u32 2147483648, %v1206_v40  ;;  %v1217_v50 = vand.u32 2147483647, %v1206_v40  ;;  %vm1213_vm3 = vweird.f32 %v1206_v40 }
 0x58e   :  { %v1220_v25 = vor.u32 1.1754944e-38, %v1219_v48  ;;  %vm1218_vm5 = vcmp.eq.f32.partialorder %v1217_v50, 8.507059e+37 }
 0x591   :  { %v1434_v41 = vpop.eup %1433 }
 0x592   :  { %v1436_v36 = vpop.eup %1435  ;;  %v1207_v42 = vadd.f32 1.0, %v1434_v41 }
 0x593   :  { %v1209_v43 = vmul.f32 %v1436_v36, %v1206_v40  ;;  %vm1214_vm2 = vweird.f32 %v1436_v36 }
 0x594   :  { %1437 = vrcp.f32 %v1207_v42  ;;  %vm1215_vm4 = vmor %vm1213_vm3, %vm1214_vm2  ;;  %v1234_v26 = vand.u32 2147483648, %v1207_v42  ;;  %v1232_v58 = vand.u32 2147483647, %v1207_v42  ;;  %vm1228_vm7 = vweird.f32 %v1207_v42 }
 0x595   :  { %v1210_v45 = vsub.f32 1.0, %v1209_v43 }
 0x596   :  { %v1235_v59 = vor.u32 1.1754944e-38, %v1234_v26  ;;  %vm1233_vm9 = vcmp.eq.f32.partialorder %v1232_v58, 8.507059e+37 }
 0x597   :  { %v1211_v49 = vmul.f32 %v1436_v36, %v1210_v45 }
 0x599   :  { %v1212_v47 = vadd.f32 %v1436_v36, %v1211_v49 }
 0x59a   :  { %v1438_v51 = vpop.eup %1437 }
 0x59b   :  { %v1216_v52 = vsel %vm1215_vm4, %v1436_v36, %v1212_v47  ;;  %v1224_v53 = vmul.f32 %v1438_v51, %v1207_v42  ;;  %vm1229_vm6 = vweird.f32 %v1438_v51 }
 0x59c   :  { %v1221_v54 = vsel %vm1218_vm5, %v1220_v25, %v1216_v52  ;;  %vm1230_vm8 = vmor %vm1228_vm7, %vm1229_vm6 }
 0x59d   :  { %v1238_v56 = vmul.f32 %v1221_v54, %v2038_v34  ;;  %v1225_v28 = vsub.f32 1.0, %v1224_v53 }
 0x59f   :  { %v1226_v60 = vmul.f32 %v1438_v51, %v1225_v28  ;;  %1242 = vrot.lane.b32.xlu0 %v1238_v56, %s1470_s8 }
 0x5a1   :  { %v1227_v57 = vadd.f32 %v1438_v51, %v1226_v60 }
 0x5a3   :  { %v1231_v61 = vsel %vm1230_vm8, %v1438_v51, %v1227_v57 }
 0x5a4   :  { %v1236_v23 = vsel %vm1233_vm9, %v1235_v59, %v1231_v61 }
 0x5a5   :  { %v1239_v62 = vmul.f32 %v1236_v23, %v2041_v35 }
 0x5a7   :  { %1244 = vrot.lane.b32.xlu2 %v1239_v62, %s1470_s8 }
 0x601   :  { %v1245_v9 = vpop.permute.xlu2 %1244 }
 0x602   :  { %v1249_v10 = vmul.f32 %v1245_v9, %v2041_v35 }
 0x611   :  { %v1243_v7 = vpop.permute.xlu0 %1242 }
 0x612   :  { %v1248_v8 = vmul.f32 %v1243_v7, %v2038_v34 }
 0x614   :  { %1370 = vmatmul.msk.f32.vlgmr.msra.gmra.mxu1 %vm1258_vm10, %v1248_v8 }
 0x61c   :  { %1371 = vmatmul.msk.f32.gmra.mxu1 %vm1258_vm10, %v1249_v10 }
 0x691   :  { %v1282_v11 = vpop.f32.mrf.mxu1 }
 0x692   :  { %v1288_v37 = vadd.f32 %v1282_v11, %v2000_v55 }
 0x694   :  { %1290 = vst.msk [vmem:[#allocation2] sm:$0xff] %vm46_vm0, %v1288_v37 }
 0x699   :  { %v1285_v12 = vpop.f32.mrf.mxu1 }
 0x69a   :  { %v1289_v13 = vadd.f32 %v1285_v12, %v2012_v63 }
 0x69c   :  { %1291 = vst.msk [vmem:[#allocation2 + $0x8] sm:$0xff] %vm46_vm0, %v1289_v13 }
 0x69d   :  { %1304 = dma.vmem_to_hbm [thread:$0]  %s1297_s24, 256, %s1299_s6, [#allocation3], %s1472_s26, %s1472_s26, %s1473_s27  }
 0x69e   :  { %1465 = dma.done.wait [#allocation3], 256  }
 0x69f   :  { %1466 = vsyncadd [#allocation3], 4294967040 }
 0x6a0   :  { %1309 = vsyncpa [#allocation3], 1 }

</bundles_post_ra>
